<compile_context>
chip_gen: v7x
topology: tpu7x:2x2x1
jax: 0.10.0
libtpu: 0.0.40
codegen_flags: <defaults>
</compile_context>

<pallas_src>
import jax
import jax.numpy as jnp
import numpy as np
from jax.experimental import pallas as pl
from jax.experimental.pallas import tpu as pltpu

IN_FEATURES = 2048
EPS = 1e-8


def _round_up(x, m):
    return (x + m - 1) // m * m


def _device_kind() -> str:
    try:
        return jax.devices()[0].device_kind.lower()
    except Exception:
        return ""


def _vmem_limit_bytes() -> int:
    """Generation-aware VMEM budget with ~25% headroom for compiler scratch."""
    try:
        cap = pltpu.get_tpu_info().vmem_capacity_bytes
    except Exception:
        cap = 64 * 1024 * 1024  # conservative fallback
    return min(int(cap * 3 // 4), 100 * 1024 * 1024)


def _dimension_semantics(kind: str):
    # v7x has 2 TensorCores per chip; core-level sharding of the M axis needs
    # CORE_PARALLEL.  Plain "parallel" is safe (and near-no-op) on 1-TC chips.
    if "v7" in kind and hasattr(pltpu, "CORE_PARALLEL"):
        return (pltpu.CORE_PARALLEL,)
    return ("parallel",)


def _pick_tm(M: int, *, tm=None, two_cores: bool = False) -> int:
    if tm is None:
        tm = 512  # large DMA granularity; ~85% HBM roofline in tile sweeps
    tm = min(tm, _round_up(M, 16))  # shrink for tiny M; 16 = bf16 sublane pack
    if two_cores and pl.cdiv(M, tm) < 2 and M > 16:
        # Make sure both v7x TensorCores get at least one M tile.
        tm = max(16, _round_up(pl.cdiv(M, 2), 16))
    return tm


def _resident_spec(block_shape, nbytes: int) -> pl.BlockSpec:
    """BlockSpec for a grid-invariant (VMEM-resident) operand.

    Single-buffer it when double-buffering the invariant block would waste
    meaningful VMEM (matters on v7x's 64 MiB at large embed sizes).
    """
    index_map = lambda i: (0, 0)
    if nbytes >= 8 * 1024 * 1024 and hasattr(pl, "Buffered"):
        return pl.BlockSpec(block_shape, index_map, pipeline_mode=pl.Buffered(1))
    return pl.BlockSpec(block_shape, index_map)


def encoder_region_kernel(x_ref, w_ref, b_ref, o_ref):
    """One M tile: full-K matmul (bf16 operands, f32 acc) + bias + L2 norm."""
    # Cast activations to bf16 in-register (MXU-native); x itself is read from
    # HBM exactly once in its original dtype (no wrapper-side cast pass).
    x = x_ref[...].astype(jnp.bfloat16)
    y = jnp.dot(x, w_ref[...], preferred_element_type=jnp.float32)
    y = y + b_ref[...]                                   # (tm, E) + (1, E)
    # Matches the PyTorch l2norm: sqrt(sum(x^2)) + eps  (eps added, not clamped).
    norm = jnp.sqrt(jnp.sum(y * y, axis=-1, keepdims=True)) + EPS
    o_ref[...] = (y * pl.reciprocal(norm, approx=True)).astype(o_ref.dtype)
    # TODO(synk): v5e / very large E (MXU-bound): stagger the epilogue with a
    # ping-pong f32 scratch so bias+norm+store of tile i-1 overlaps tile i's matmul.


def encoder_region_forward(x, w, b, *, tm=None, out_dtype=None):
    """x: (..., 2048); w: (2048, E) ideally pre-cast bf16; b: (E,).

    Returns the same leading dims with last dim E (dtype = x.dtype unless
    out_dtype is given; pass bf16 explicitly if downstream tolerates it).
    """
    orig_shape = x.shape
    x2 = x.reshape(-1, IN_FEATURES)
    M = x2.shape[0]
    K, E = w.shape
    assert K == IN_FEATURES, f"expected in_features={IN_FEATURES}, got {K}"

    if w.dtype != jnp.bfloat16:
        # NOTE: prefer casting the weight ONCE at init and passing bf16 here;
        # this per-call cast costs an extra K*E*(4+2) bytes of HBM traffic.
        w = w.astype(jnp.bfloat16)
    b2 = b.reshape(1, E).astype(jnp.float32)
    out_dtype = out_dtype if out_dtype is not None else x.dtype

    kind = _device_kind()
    tm_eff = _pick_tm(M, tm=tm, two_cores=("v7" in kind))
    grid_m = pl.cdiv(M, tm_eff)  # ragged last block handled by Pallas, no padding

    # TODO(synk): for E >= ~4096 on v7x (64 MiB VMEM) tile W/out along N
    # (tn ~ 1024-2048), accumulate a per-row sum-of-squares f32 scratch across
    # the "arbitrary" N axis, and rescale by rsqrt(ssq) in a finalize pass.
    out = pl.pallas_call(
        encoder_region_kernel,
        out_shape=jax.ShapeDtypeStruct((M, E), out_dtype),
        grid_spec=pltpu.PrefetchScalarGridSpec(
            num_scalar_prefetch=0,
            grid=(grid_m,),
            in_specs=[
                pl.BlockSpec((tm_eff, K), lambda i: (i, 0)),   # x rows stream
                _resident_spec((K, E), K * E * 2),             # W: VMEM-resident
                _resident_spec((1, E), E * 4),                 # bias: resident
            ],
            out_specs=pl.BlockSpec((tm_eff, E), lambda i: (i, 0)),
        ),
        compiler_params=pltpu.CompilerParams(
            dimension_semantics=_dimension_semantics(kind),
            vmem_limit_bytes=_vmem_limit_bytes(),
        ),
    )(x2, w, b2)

    return out.reshape(*orig_shape[:-1], E)


def init_params(embed_size, seed=0):
    """Deterministic Xavier-uniform init, matching the PyTorch init_weights()."""
    r = np.sqrt(6.0) / np.sqrt(IN_FEATURES + embed_size)
    key = jax.random.PRNGKey(seed)
    # stored as (in_features, out_features) == PyTorch weight.T
    w = jax.random.uniform(
        key, (IN_FEATURES, embed_size), minval=-r, maxval=r, dtype=jnp.float32
    )
    b = jnp.zeros((embed_size,), dtype=jnp.float32)
    return w, b


if __name__ == "__main__":
    B, R, E = 2, 8, 256  # batch, num regions, embed_size
    key = jax.random.PRNGKey(0)
    region_feat = jax.random.normal(key, (B, R, IN_FEATURES), dtype=jnp.float32)

    w, b = init_params(E, seed=0)        # f32 master copy (PyTorch-equivalent)
    w_bf16 = w.astype(jnp.bfloat16)      # cast ONCE outside the per-call path

    out = encoder_region_forward(region_feat, w_bf16, b)
    out = jax.block_until_ready(out)
    assert out.shape == (B, R, E)

    # Pure-JAX f32 reference.  Kernel uses bf16 MXU operands + approx
    # reciprocal, hence the loosened tolerance (known precision trade).
    ref = region_feat.reshape(-1, IN_FEATURES) @ w + b
    ref = ref / (jnp.sqrt(jnp.sum(ref * ref, axis=-1, keepdims=True)) + EPS)
    ref = ref.reshape(B, R, E)
    np.testing.assert_allclose(np.asarray(out), np.asarray(ref), rtol=2e-2, atol=2e-2)

    print("KERNEL_OK")
</pallas_src>

<mosaic_0001>
module attributes {stable_mosaic.version = 11 : i64} {
  func.func @encoder_region_kernel(%arg0: i32, %arg1: memref<16x2048xf32, #tpu.memory_space<vmem>>, %arg2: memref<2048x256xbf16, #tpu.memory_space<vmem>>, %arg3: memref<1x256xf32, #tpu.memory_space<vmem>>, %arg4: memref<16x256xf32, #tpu.memory_space<vmem>>) attributes {dimension_semantics = [#tpu.dimension_semantics<parallel>], iteration_bounds = array<i64: 1>, scalar_prefetch = 0 : i64, scratch_operands = 0 : i64, tpu.core_type = #tpu.core_type<tc>, window_params = [{transform_indices = @transform_0, window_bounds = array<i64: 16, 2048>}, {pipeline_mode = #tpu.pipeline_mode<synchronous>, transform_indices = @transform_1, window_bounds = array<i64: 2048, 256>}, {pipeline_mode = #tpu.pipeline_mode<synchronous>, transform_indices = @transform_2, window_bounds = array<i64: 1, 256>}, {transform_indices = @transform_3, window_bounds = array<i64: 16, 256>}]} {
    %c0 = arith.constant 0 : index
    %c0_0 = arith.constant 0 : index
    %0 = vector.load %arg1[%c0, %c0_0] : memref<16x2048xf32, #tpu.memory_space<vmem>>, vector<16x2048xf32>
    %1 = arith.truncf %0 : vector<16x2048xf32> to vector<16x2048xbf16>
    %c0_1 = arith.constant 0 : index
    %c0_2 = arith.constant 0 : index
    %2 = vector.load %arg2[%c0_1, %c0_2] : memref<2048x256xbf16, #tpu.memory_space<vmem>>, vector<2048x256xbf16>
    %cst = arith.constant dense<0.000000e+00> : vector<16x256xf32>
    %3 = tpu.matmul %1, %2, %cst {dimension_numbers = #tpu.dot_dimension_numbers<[1], [0], [0], [1], [0, 0, 1, 1], [], []>} : vector<16x2048xbf16>, vector<2048x256xbf16>, vector<16x256xf32> -> vector<16x256xf32>
    %c0_3 = arith.constant 0 : index
    %c0_4 = arith.constant 0 : index
    %4 = vector.load %arg3[%c0_3, %c0_4] : memref<1x256xf32, #tpu.memory_space<vmem>>, vector<1x256xf32>
    %5 = vector.broadcast %4 : vector<1x256xf32> to vector<16x256xf32>
    %6 = arith.addf %3, %5 : vector<16x256xf32>
    %7 = arith.mulf %6, %6 : vector<16x256xf32>
    %cst_5 = arith.constant dense<0.000000e+00> : vector<16xf32>
    %8 = vector.multi_reduction <add>, %7, %cst_5 [1] : vector<16x256xf32> to vector<16xf32>
    %9 = vector.shape_cast %8 : vector<16xf32> to vector<16x1xf32>
    %10 = math.sqrt %9 : vector<16x1xf32>
    %cst_6 = arith.constant 9.99999993E-9 : f32
    %11 = vector.broadcast %cst_6 : f32 to vector<16x1xf32>
    %12 = arith.addf %10, %11 : vector<16x1xf32>
    %13 = tpu.reciprocal %12 {approx = true} : vector<16x1xf32> -> vector<16x1xf32>
    %14 = vector.broadcast %13 : vector<16x1xf32> to vector<16x256xf32>
    %15 = arith.mulf %6, %14 : vector<16x256xf32>
    %c0_7 = arith.constant 0 : index
    %c0_8 = arith.constant 0 : index
    %16 = vector.load %arg4[%c0_7, %c0_8] : memref<16x256xf32, #tpu.memory_space<vmem>>, vector<16x256xf32>
    tpu.vector_store %arg4[%c0_7, %c0_8], %15 {strides = array<i32>} : memref<16x256xf32, #tpu.memory_space<vmem>>, vector<16x256xf32>,
    return
  }
  func.func @transform_0(%arg0: i32) -> (i32, i32) {
    %c0_i32 = arith.constant 0 : i32
    %c0_i32_0 = arith.constant 0 : i32
    return %arg0, %c0_i32 : i32, i32
  }
  func.func @transform_1(%arg0: i32) -> (i32, i32) {
    %c0_i32 = arith.constant 0 : i32
    %c0_i32_0 = arith.constant 0 : i32
    %c0_i32_1 = arith.constant 0 : i32
    return %c0_i32, %c0_i32_0 : i32, i32
  }
  func.func @transform_2(%arg0: i32) -> (i32, i32) {
    %c0_i32 = arith.constant 0 : i32
    %c0_i32_0 = arith.constant 0 : i32
    %c0_i32_1 = arith.constant 0 : i32
    return %c0_i32, %c0_i32_0 : i32, i32
  }
  func.func @transform_3(%arg0: i32) -> (i32, i32) {
    %c0_i32 = arith.constant 0 : i32
    %c0_i32_0 = arith.constant 0 : i32
    return %arg0, %c0_i32 : i32, i32
  }
}

</mosaic_0001>

<bundles_post_ra>
// kernel: tpu_custom_call.1
= control target key start
LH: loop header
LB: loop body
LE: loop exit
PB: predicated region body
PF: predicated region fallthrough
CT: control target
= control target key end

     0   :  { %8 = vsyncpa [#allocation3], 0  ;;  %s2864_s0 = inlined_call_operand.hbm [shape: f32[16,2048], index: 0, kind: input, shape index: {}]   ;;  %s2865_s1 = inlined_call_operand.hbm [shape: bf16[2048,256], index: 1, kind: input, shape index: {}]   ;;  %s2866_s2 = inlined_call_operand.vmem [shape: f32[1,256], index: 2, kind: input, shape index: {}]   ;;  %s2867_s3 = inlined_call_operand.hbm [shape: f32[16,256], index: 3, kind: output, shape index: {}]  }
   0x1   :  { %9 = vsyncpa [#allocation6], 0 }
   0x2   :  { %10 = vsyncpa [#allocation4], 0  ;;  %s2797_s12 = smov [#allocation2]   ;;  %s2725_s16 = scalar_lea.hbm %s2864_s0, 4096 }
   0x3   :  { %s16_s13 = sshll.u32 %s2797_s12, 4  ;;  %p2726_p0 = scmp.ne.s32.totalorder %s2864_s0, %s2725_s16  ;;  %s17_s13 = int_to_ptr.vmem [resolvable:$true] %s16_s13 }
   0x4   :  { %p2729_p1 = scmp.lt.u32.totalorder %s2725_s16, %s2864_s0 }
   0x6   :  { %p2731_p2 = pnand %p2729_p1, %p2726_p0 }
   0x8   :  { %2734 = shalt.err (!%p2731_p2)
}
   0x9   :  { %s2735_s21 = scalar_lea.vmem %s17_s13, 4096  ;;  %p2740_p4 = scmp.lt.s32.totalorder %s17_s13, %s17_s13 }
   0xa   :  { %p2736_p3 = scmp.ne.s32.totalorder %s17_s13, %s2735_s21  ;;  %p2741_p5 = scmp.lt.s32.totalorder %s2735_s21, %s2735_s21 }
   0xc   :  { %p2742_p6 = por %p2741_p5, %p2740_p4 }
   0xe   :  { %p2743_p7 = pnand %p2742_p6, %p2736_p3 }
  0x10   :  { %2746 = shalt.err (!%p2743_p7)
}
  0x11   :  { %s2798_s22 = smov 2048   ;;  %s2799_s23 = smov 128  }
  0x12   :  { %22 = dma.hbm_to_vmem [thread:$0]  %s2864_s0, 4096, %s17_s13, [#allocation3], %s2798_s22, %s2798_s22, %s2799_s23  }
  0x13   :  { %s2800_s26 = smov [#allocation5]   ;;  %s2747_s30 = scalar_lea.hbm %s2865_s1, 32768 }
  0x14   :  { %s28_s27 = sshll.u32 %s2800_s26, 4  ;;  %p2748_p8 = scmp.ne.s32.totalorder %s2865_s1, %s2747_s30  ;;  %s29_s27 = int_to_ptr.vmem [resolvable:$true] %s28_s27 }
  0x15   :  { %p2751_p9 = scmp.lt.u32.totalorder %s2747_s30, %s2865_s1 }
  0x17   :  { %p2753_p10 = pnand %p2751_p9, %p2748_p8 }
  0x19   :  { %2756 = shalt.err (!%p2753_p10)
}
  0x1a   :  { %s2757_s8 = scalar_lea.vmem %s29_s27, 32768  ;;  %p2762_p12 = scmp.lt.s32.totalorder %s29_s27, %s29_s27 }
  0x1b   :  { %p2758_p11 = scmp.ne.s32.totalorder %s29_s27, %s2757_s8  ;;  %p2763_p13 = scmp.lt.s32.totalorder %s2757_s8, %s2757_s8 }
  0x1d   :  { %p2764_p0 = por %p2763_p13, %p2762_p12 }
  0x1f   :  { %p2765_p1 = pnand %p2764_p0, %p2758_p11 }
  0x21   :  { %2768 = shalt.err (!%p2765_p1)
}
  0x22   :  { %s2801_s0 = smov 8  }
  0x23   :  { %34 = dma.hbm_to_vmem [thread:$0]  %s2865_s1, 32768, %s29_s27, [#allocation6], %s2799_s23, %s2799_s23, %s2801_s0  }
  0x24   :  { %2791 = dma.done.wait [#allocation3], 4096  }
  0x25   :  { %2792 = vsyncadd [#allocation3], 4294963200 }
  0x26   :  { %2793 = dma.done.wait [#allocation6], 32768  }
  0x27   :  { %2794 = vsyncadd [#allocation6], 4294934528  ;;  %v2333_v0 = vld [vmem:[#allocation5 + $0x4] ss:$8 sps:$4 sm:$0xff]   ;;  %v2337_v2 = vld [vmem:[#allocation5] ss:$8 sps:$4 sm:$0xff]  }
  0x28   :  { %v2335_v1 = vld [vmem:[#allocation5 + $0x404] ss:$8 sps:$4 sm:$0xff]   ;;  %1639 = vmatprep.subr.bf16.mxu1 %v2333_v0  ;;  %v2338_v3 = vld [vmem:[#allocation5 + $0x400] ss:$8 sps:$4 sm:$0xff]   ;;  %v2339_v4 = vld [vmem:[#allocation5 + $0x14] ss:$8 sps:$4 sm:$0xff]  }
  0x29   :  { %1811 = vmatprep.subr.bf16.mxu0 %v2335_v1  ;;  %1640 = vmatpush1.bf16.msra.mxu1 %v2337_v2  ;;  %v2341_v5 = vld [vmem:[#allocation5 + $0x414] ss:$8 sps:$4 sm:$0xff]   ;;  %v2343_v6 = vld [vmem:[#allocation5 + $0x10] ss:$8 sps:$4 sm:$0xff]   ;;  %v2345_v8 = vld [vmem:[#allocation5 + $0x24] ss:$8 sps:$4 sm:$0xff]  }
  0x2a   :  { %1812 = vmatpush1.bf16.msra.mxu0 %v2338_v3  ;;  %1641 = vmatprep.subr.bf16.mxu1 %v2339_v4  ;;  %v2344_v7 = vld [vmem:[#allocation5 + $0x410] ss:$8 sps:$4 sm:$0xff]   ;;  %v2347_v9 = vld [vmem:[#allocation5 + $0x424] ss:$8 sps:$4 sm:$0xff]   ;;  %v2349_v10 = vld [vmem:[#allocation5 + $0x20] ss:$8 sps:$4 sm:$0xff]  }
  0x2b   :  { %1813 = vmatprep.subr.bf16.mxu0 %v2341_v5  ;;  %v2350_v11 = vld [vmem:[#allocation5 + $0x420] ss:$8 sps:$4 sm:$0xff]   ;;  %v2351_v12 = vld [vmem:[#allocation5 + $0x34] ss:$8 sps:$4 sm:$0xff]   ;;  %v2355_v14 = vld [vmem:[#allocation5 + $0x30] ss:$8 sps:$4 sm:$0xff]  }
  0x2c   :  { %v2353_v13 = vld [vmem:[#allocation5 + $0x434] ss:$8 sps:$4 sm:$0xff]   ;;  %v2356_v15 = vld [vmem:[#allocation5 + $0x430] ss:$8 sps:$4 sm:$0xff]   ;;  %v2357_v16 = vld [vmem:[#allocation5 + $0x44] ss:$8 sps:$4 sm:$0xff]  }
  0x2d   :  { %1642 = vmatpush1.bf16.msra.mxu1 %v2343_v6  ;;  %v2359_v17 = vld [vmem:[#allocation5 + $0x444] ss:$8 sps:$4 sm:$0xff]   ;;  %v2361_v18 = vld [vmem:[#allocation5 + $0x40] ss:$8 sps:$4 sm:$0xff]   ;;  %v2363_v20 = vld [vmem:[#allocation5 + $0x54] ss:$8 sps:$4 sm:$0xff]  }
  0x2e   :  { %1814 = vmatpush1.bf16.msra.mxu0 %v2344_v7  ;;  %1643 = vmatprep.subr.bf16.mxu1 %v2345_v8  ;;  %v2362_v19 = vld [vmem:[#allocation5 + $0x440] ss:$8 sps:$4 sm:$0xff]   ;;  %v2365_v21 = vld [vmem:[#allocation5 + $0x454] ss:$8 sps:$4 sm:$0xff]   ;;  %v2367_v22 = vld [vmem:[#allocation5 + $0x50] ss:$8 sps:$4 sm:$0xff]  }
  0x2f   :  { %1815 = vmatprep.subr.bf16.mxu0 %v2347_v9  ;;  %v2368_v23 = vld [vmem:[#allocation5 + $0x450] ss:$8 sps:$4 sm:$0xff]   ;;  %v2369_v24 = vld [vmem:[#allocation5 + $0x64] ss:$8 sps:$4 sm:$0xff]   ;;  %v2373_v26 = vld [vmem:[#allocation5 + $0x60] ss:$8 sps:$4 sm:$0xff]  }
  0x30   :  { %v2371_v25 = vld [vmem:[#allocation5 + $0x464] ss:$8 sps:$4 sm:$0xff]   ;;  %v2374_v27 = vld [vmem:[#allocation5 + $0x460] ss:$8 sps:$4 sm:$0xff]   ;;  %v2375_v28 = vld [vmem:[#allocation5 + $0x74] ss:$8 sps:$4 sm:$0xff]  }
  0x31   :  { %1644 = vmatpush1.bf16.msra.mxu1 %v2349_v10  ;;  %v2377_v29 = vld [vmem:[#allocation5 + $0x474] ss:$8 sps:$4 sm:$0xff]   ;;  %v2379_v30 = vld [vmem:[#allocation5 + $0x70] ss:$8 sps:$4 sm:$0xff]   ;;  %v2381_v32 = vld [vmem:[#allocation5 + $0x84] ss:$8 sps:$4 sm:$0xff]  }
  0x32   :  { %1816 = vmatpush1.bf16.msra.mxu0 %v2350_v11  ;;  %1645 = vmatprep.subr.bf16.mxu1 %v2351_v12  ;;  %v2380_v31 = vld [vmem:[#allocation5 + $0x470] ss:$8 sps:$4 sm:$0xff]   ;;  %v2383_v33 = vld [vmem:[#allocation5 + $0x484] ss:$8 sps:$4 sm:$0xff]   ;;  %v2385_v34 = vld [vmem:[#allocation5 + $0x80] ss:$8 sps:$4 sm:$0xff]  }
  0x33   :  { %1817 = vmatprep.subr.bf16.mxu0 %v2353_v13  ;;  %v2386_v35 = vld [vmem:[#allocation5 + $0x480] ss:$8 sps:$4 sm:$0xff]   ;;  %v2387_v36 = vld [vmem:[#allocation5 + $0x94] ss:$8 sps:$4 sm:$0xff]   ;;  %v2391_v38 = vld [vmem:[#allocation5 + $0x90] ss:$8 sps:$4 sm:$0xff]  }
  0x34   :  { %v2389_v37 = vld [vmem:[#allocation5 + $0x494] ss:$8 sps:$4 sm:$0xff]   ;;  %v2392_v39 = vld [vmem:[#allocation5 + $0x490] ss:$8 sps:$4 sm:$0xff]   ;;  %v2393_v40 = vld [vmem:[#allocation5 + $0xa4] ss:$8 sps:$4 sm:$0xff]  }
  0x35   :  { %1646 = vmatpush1.bf16.msra.mxu1 %v2355_v14  ;;  %v2395_v41 = vld [vmem:[#allocation5 + $0x4a4] ss:$8 sps:$4 sm:$0xff]   ;;  %v2397_v42 = vld [vmem:[#allocation5 + $0xa0] ss:$8 sps:$4 sm:$0xff]   ;;  %v2399_v44 = vld [vmem:[#allocation5 + $0xb4] ss:$8 sps:$4 sm:$0xff]  }
  0x36   :  { %1818 = vmatpush1.bf16.msra.mxu0 %v2356_v15  ;;  %1647 = vmatprep.subr.bf16.mxu1 %v2357_v16  ;;  %v2398_v43 = vld [vmem:[#allocation5 + $0x4a0] ss:$8 sps:$4 sm:$0xff]   ;;  %v2401_v45 = vld [vmem:[#allocation5 + $0x4b4] ss:$8 sps:$4 sm:$0xff]   ;;  %v2403_v46 = vld [vmem:[#allocation5 + $0xb0] ss:$8 sps:$4 sm:$0xff]  }
  0x37   :  { %1819 = vmatprep.subr.bf16.mxu0 %v2359_v17  ;;  %v2404_v47 = vld [vmem:[#allocation5 + $0x4b0] ss:$8 sps:$4 sm:$0xff]   ;;  %v44_v48 = vld [vmem:[#allocation2 + $0x8] sm:$0xff]  ;;  %v2411_v58 = vld [vmem:[#allocation5 + $0xd4] ss:$8 sps:$4 sm:$0xff]  }
  0x38   :  { %v60_v49 = vld [vmem:[#allocation2 + $0x88] sm:$0xff]  ;;  %v2413_v59 = vld [vmem:[#allocation5 + $0x4d4] ss:$8 sps:$4 sm:$0xff]   ;;  %v2415_v60 = vld [vmem:[#allocation5 + $0xd0] ss:$8 sps:$4 sm:$0xff]  }
  0x39   :  { %1648 = vmatpush1.bf16.msra.mxu1 %v2361_v18  ;;  %v2405_v50 = vld [vmem:[#allocation5 + $0xc4] ss:$8 sps:$4 sm:$0xff]   ;;  %v76_v52 = vpack.c.bf16 %v60_v49, %v44_v48  ;;  %v2409_v56 = vld [vmem:[#allocation5 + $0xc0] ss:$8 sps:$4 sm:$0xff]   ;;  %v2416_v61 = vld [vmem:[#allocation5 + $0x4d0] ss:$8 sps:$4 sm:$0xff]  }
  0x3a   :  { %1820 = vmatpush1.bf16.msra.mxu0 %v2362_v19  ;;  %1649 = vmatprep.subr.bf16.mxu1 %v2363_v20  ;;  %v2407_v51 = vld [vmem:[#allocation5 + $0x4c4] ss:$8 sps:$4 sm:$0xff]   ;;  %v2410_v57 = vld [vmem:[#allocation5 + $0x4c0] ss:$8 sps:$4 sm:$0xff]   ;;  %v2423_v2 = vld [vmem:[#allocation5 + $0xf4] ss:$8 sps:$4 sm:$0xff]  }
  0x3b   :  { %1821 = vmatprep.subr.bf16.mxu0 %v2365_v21  ;;  %v52_v53 = vld [vmem:[#allocation2 + $0x48] sm:$0xff]  ;;  %1671 = vmatprep.mubr.bf16.mxu1 %v76_v52  ;;  %v2425_v3 = vld [vmem:[#allocation5 + $0x4f4] ss:$8 sps:$4 sm:$0xff]   ;;  %v2427_v4 = vld [vmem:[#allocation5 + $0xf0] ss:$8 sps:$4 sm:$0xff]  }
  0x3c   :  { %v68_v54 = vld [vmem:[#allocation2 + $0xc8] sm:$0xff]  ;;  %v2428_v5 = vld [vmem:[#allocation5 + $0x4f0] ss:$8 sps:$4 sm:$0xff]   ;;  %v43_v6 = vld [vmem:[#allocation2] sm:$0xff] }
  0x3d   :  { %1650 = vmatpush1.bf16.msra.mxu1 %v2367_v22  ;;  %v84_v55 = vpack.c.bf16 %v68_v54, %v52_v53  ;;  %v2417_v62 = vld [vmem:[#allocation5 + $0xe4] ss:$8 sps:$4 sm:$0xff]   ;;  %v2421_v0 = vld [vmem:[#allocation5 + $0xe0] ss:$8 sps:$4 sm:$0xff]   ;;  %v2437_v16 = vld [vmem:[#allocation5 + $0x114] ss:$8 sps:$4 sm:$0xff]  }
  0x3e   :  { %1822 = vmatpush1.bf16.msra.mxu0 %v2368_v23  ;;  %1651 = vmatprep.subr.bf16.mxu1 %v2369_v24  ;;  %v2419_v63 = vld [vmem:[#allocation5 + $0x4e4] ss:$8 sps:$4 sm:$0xff]   ;;  %v2422_v1 = vld [vmem:[#allocation5 + $0x4e0] ss:$8 sps:$4 sm:$0xff]   ;;  %v2440_v17 = vld [vmem:[#allocation5 + $0x514] ss:$8 sps:$4 sm:$0xff]  }
  0x3f   :  { %1823 = vmatprep.subr.bf16.mxu0 %v2371_v25  ;;  %1843 = vmatprep.mubr.bf16.mxu0 %v84_v55  ;;  %v2431_v7 = vld [vmem:[#allocation5 + $0x104] ss:$8 sps:$4 sm:$0xff]   ;;  %v2429_v12 = vld [vmem:[#allocation5 + $0x100] ss:$8 sps:$4 sm:$0xff]   ;;  %v2435_v18 = vld [vmem:[#allocation5 + $0x110] ss:$8 sps:$4 sm:$0xff]  }
  0x40   :  { %v59_v8 = vld [vmem:[#allocation2 + $0x80] sm:$0xff]  ;;  %v2438_v19 = vld [vmem:[#allocation5 + $0x510] ss:$8 sps:$4 sm:$0xff]   ;;  %v2449_v24 = vld [vmem:[#allocation5 + $0x134] ss:$8 sps:$4 sm:$0xff]  }
  0x41   :  { %1652 = vmatpush1.bf16.msra.mxu1 %v2373_v26  ;;  %v51_v9 = vld [vmem:[#allocation2 + $0x40] sm:$0xff]  ;;  %v75_v14 = vpack.c.bf16 %v59_v8, %v43_v6  ;;  %v2452_v25 = vld [vmem:[#allocation5 + $0x534] ss:$8 sps:$4 sm:$0xff]   ;;  %v2447_v26 = vld [vmem:[#allocation5 + $0x130] ss:$8 sps:$4 sm:$0xff]  }
  0x42   :  { %1824 = vmatpush1.bf16.msra.mxu0 %v2374_v27  ;;  %1653 = vmatprep.subr.bf16.mxu1 %v2375_v28  ;;  %v67_v10 = vld [vmem:[#allocation2 + $0xc0] sm:$0xff]  ;;  %v2450_v27 = vld [vmem:[#allocation5 + $0x530] ss:$8 sps:$4 sm:$0xff]   ;;  %v2485_v54 = vld [vmem:[#allocation5 + $0x194] ss:$8 sps:$4 sm:$0xff]  }
  0x43   :  { %1825 = vmatprep.subr.bf16.mxu0 %v2377_v29  ;;  %v2434_v11 = vld [vmem:[#allocation5 + $0x504] ss:$8 sps:$4 sm:$0xff]   ;;  %v2432_v13 = vld [vmem:[#allocation5 + $0x500] ss:$8 sps:$4 sm:$0xff]   ;;  %v83_v15 = vpack.c.bf16 %v67_v10, %v51_v9  ;;  %v2471_v48 = vld [vmem:[#allocation5 + $0x170] ss:$8 sps:$4 sm:$0xff]  }
  0x44   :  { %v2443_v20 = vld [vmem:[#allocation5 + $0x124] ss:$8 sps:$4 sm:$0xff]   ;;  %v2441_v22 = vld [vmem:[#allocation5 + $0x120] ss:$8 sps:$4 sm:$0xff]   ;;  %v2474_v49 = vld [vmem:[#allocation5 + $0x570] ss:$8 sps:$4 sm:$0xff]  }
  0x45   :  { %1654 = vmatpush1.bf16.msra.mxu1 %v2379_v30  ;;  %v2446_v21 = vld [vmem:[#allocation5 + $0x524] ss:$8 sps:$4 sm:$0xff]   ;;  %v2444_v23 = vld [vmem:[#allocation5 + $0x520] ss:$8 sps:$4 sm:$0xff]   ;;  %v2488_v55 = vld [vmem:[#allocation5 + $0x594] ss:$8 sps:$4 sm:$0xff]  }
  0x46   :  { %1826 = vmatpush1.bf16.msra.mxu0 %v2380_v31  ;;  %1655 = vmatprep.subr.bf16.mxu1 %v2381_v32  ;;  %v2455_v28 = vld [vmem:[#allocation5 + $0x144] ss:$8 sps:$4 sm:$0xff]   ;;  %v2453_v30 = vld [vmem:[#allocation5 + $0x140] ss:$8 sps:$4 sm:$0xff]   ;;  %v2461_v32 = vld [vmem:[#allocation5 + $0x154] ss:$8 sps:$4 sm:$0xff]  }
  0x47   :  { %1827 = vmatprep.subr.bf16.mxu0 %v2383_v33  ;;  %v2458_v29 = vld [vmem:[#allocation5 + $0x544] ss:$8 sps:$4 sm:$0xff]   ;;  %v2456_v31 = vld [vmem:[#allocation5 + $0x540] ss:$8 sps:$4 sm:$0xff]   ;;  %v2464_v33 = vld [vmem:[#allocation5 + $0x554] ss:$8 sps:$4 sm:$0xff]  }
  0x48   :  { %v2477_v52 = vld [vmem:[#allocation5 + $0x180] ss:$8 sps:$4 sm:$0xff]   ;;  %v2509_v6 = vld [vmem:[#allocation5 + $0x1d4] ss:$8 sps:$4 sm:$0xff]   ;;  %v2507_v8 = vld [vmem:[#allocation5 + $0x1d0] ss:$8 sps:$4 sm:$0xff]  }
  0x49   :  { %1656 = vmatpush1.bf16.msra.mxu1 %v2385_v34  ;;  %v2459_v34 = vld [vmem:[#allocation5 + $0x150] ss:$8 sps:$4 sm:$0xff]   ;;  %v2480_v53 = vld [vmem:[#allocation5 + $0x580] ss:$8 sps:$4 sm:$0xff]   ;;  %v2515_v10 = vld [vmem:[#allocation5 + $0x1e4] ss:$8 sps:$4 sm:$0xff]  }
  0x4a   :  { %1828 = vmatpush1.bf16.msra.mxu0 %v2386_v35  ;;  %1657 = vmatprep.subr.bf16.mxu1 %v2387_v36  ;;  %v2462_v35 = vld [vmem:[#allocation5 + $0x550] ss:$8 sps:$4 sm:$0xff]   ;;  %v2467_v36 = vld [vmem:[#allocation5 + $0x164] ss:$8 sps:$4 sm:$0xff]  }
  0x4b   :  { %1829 = vmatprep.subr.bf16.mxu0 %v2389_v37  ;;  %v2470_v37 = vld [vmem:[#allocation5 + $0x564] ss:$8 sps:$4 sm:$0xff]   ;;  %v2510_v9 = vld [vmem:[#allocation5 + $0x5d0] ss:$8 sps:$4 sm:$0xff]  }
  0x4d   :  { %1658 = vmatpush1.bf16.msra.mxu1 %v2391_v38  ;;  %v2465_v38 = vld [vmem:[#allocation5 + $0x160] ss:$8 sps:$4 sm:$0xff]  }
  0x4e   :  { %1830 = vmatpush1.bf16.msra.mxu0 %v2392_v39  ;;  %1659 = vmatprep.subr.bf16.mxu1 %v2393_v40  ;;  %v2468_v39 = vld [vmem:[#allocation5 + $0x560] ss:$8 sps:$4 sm:$0xff]   ;;  %v46_v40 = vld [vmem:[#allocation2 + $0x18] sm:$0xff] }
  0x4f   :  { %1831 = vmatprep.subr.bf16.mxu0 %v2395_v41  ;;  %v62_v41 = vld [vmem:[#allocation2 + $0x98] sm:$0xff] }
  0x51   :  { %1660 = vmatpush1.bf16.msra.mxu1 %v2397_v42  ;;  %v2473_v42 = vld [vmem:[#allocation5 + $0x174] ss:$8 sps:$4 sm:$0xff]  }
  0x52   :  { %1832 = vmatpush1.bf16.msra.mxu0 %v2398_v43  ;;  %1661 = vmatprep.subr.bf16.mxu1 %v2399_v44  ;;  %v2476_v43 = vld [vmem:[#allocation5 + $0x574] ss:$8 sps:$4 sm:$0xff]   ;;  %v78_v44 = vpack.c.bf16 %v62_v41, %v46_v40  ;;  %v2540_v40 = vld [vmem:[#allocation5 + $0x620] ss:$8 sps:$4 sm:$0xff]  }
  0x53   :  { %1833 = vmatprep.subr.bf16.mxu0 %v2401_v45  ;;  %v54_v45 = vld [vmem:[#allocation2 + $0x58] sm:$0xff] }
  0x55   :  { %1662 = vmatpush1.bf16.msra.mxu1 %v2403_v46  ;;  %v70_v46 = vld [vmem:[#allocation2 + $0xd8] sm:$0xff] }
  0x56   :  { %1834 = vmatpush1.bf16.msra.mxu0 %v2404_v47  ;;  %1663 = vmatprep.subr.bf16.mxu1 %v2405_v50  ;;  %v86_v47 = vpack.c.bf16 %v70_v46, %v54_v45  ;;  %v2479_v50 = vld [vmem:[#allocation5 + $0x184] ss:$8 sps:$4 sm:$0xff]   ;;  %v2546_v45 = vld [vmem:[#allocation5 + $0x630] ss:$8 sps:$4 sm:$0xff]  }
  0x57   :  { %1835 = vmatprep.subr.bf16.mxu0 %v2407_v51  ;;  %v2482_v51 = vld [vmem:[#allocation5 + $0x584] ss:$8 sps:$4 sm:$0xff]  }
  0x58   :  { %v2551_v46 = vld [vmem:[#allocation5 + $0x244] ss:$8 sps:$4 sm:$0xff]  }
  0x59   :  { %1664 = vmatpush1.bf16.msra.mxu1 %v2409_v56  ;;  %v2483_v56 = vld [vmem:[#allocation5 + $0x190] ss:$8 sps:$4 sm:$0xff]  }
  0x5a   :  { %1836 = vmatpush1.bf16.msra.mxu0 %v2410_v57  ;;  %1665 = vmatprep.subr.bf16.mxu1 %v2411_v58  ;;  %v2486_v57 = vld [vmem:[#allocation5 + $0x590] ss:$8 sps:$4 sm:$0xff]   ;;  %v2491_v58 = vld [vmem:[#allocation5 + $0x1a4] ss:$8 sps:$4 sm:$0xff]  }
  0x5b   :  { %1837 = vmatprep.subr.bf16.mxu0 %v2413_v59  ;;  %v2494_v59 = vld [vmem:[#allocation5 + $0x5a4] ss:$8 sps:$4 sm:$0xff]  }
  0x5d   :  { %1666 = vmatpush1.bf16.msra.mxu1 %v2415_v60  ;;  %v2489_v60 = vld [vmem:[#allocation5 + $0x1a0] ss:$8 sps:$4 sm:$0xff]  }
  0x5e   :  { %1838 = vmatpush1.bf16.msra.mxu0 %v2416_v61  ;;  %1667 = vmatprep.subr.bf16.mxu1 %v2417_v62  ;;  %v2492_v61 = vld [vmem:[#allocation5 + $0x5a0] ss:$8 sps:$4 sm:$0xff]   ;;  %v2497_v62 = vld [vmem:[#allocation5 + $0x1b4] ss:$8 sps:$4 sm:$0xff]  }
  0x5f   :  { %1839 = vmatprep.subr.bf16.mxu0 %v2419_v63  ;;  %v2500_v63 = vld [vmem:[#allocation5 + $0x5b4] ss:$8 sps:$4 sm:$0xff]  }
  0x61   :  { %1668 = vmatpush1.bf16.msra.mxu1 %v2421_v0  ;;  %v2495_v0 = vld [vmem:[#allocation5 + $0x1b0] ss:$8 sps:$4 sm:$0xff]  }
  0x62   :  { %1840 = vmatpush1.bf16.msra.mxu0 %v2422_v1  ;;  %1669 = vmatprep.subr.bf16.mxu1 %v2423_v2  ;;  %v2498_v1 = vld [vmem:[#allocation5 + $0x5b0] ss:$8 sps:$4 sm:$0xff]   ;;  %v2503_v2 = vld [vmem:[#allocation5 + $0x1c4] ss:$8 sps:$4 sm:$0xff]  }
  0x63   :  { %1841 = vmatprep.subr.bf16.mxu0 %v2425_v3  ;;  %v2506_v3 = vld [vmem:[#allocation5 + $0x5c4] ss:$8 sps:$4 sm:$0xff]  }
  0x65   :  { %1670 = vmatpush1.bf16.msra.mxu1 %v2427_v4  ;;  %v2501_v4 = vld [vmem:[#allocation5 + $0x1c0] ss:$8 sps:$4 sm:$0xff]  }
  0x66   :  { %1842 = vmatpush1.bf16.msra.mxu0 %v2428_v5  ;;  %1682 = vmatprep.subr.bf16.mxu1 %v2431_v7  ;;  %v2504_v5 = vld [vmem:[#allocation5 + $0x5c0] ss:$8 sps:$4 sm:$0xff]   ;;  %v2512_v7 = vld [vmem:[#allocation5 + $0x5d4] ss:$8 sps:$4 sm:$0xff]  }
  0x67   :  { %1854 = vmatprep.subr.bf16.mxu0 %v2434_v11  ;;  %v2518_v11 = vld [vmem:[#allocation5 + $0x5e4] ss:$8 sps:$4 sm:$0xff]  }
  0x68   :  { %1672 = vmatmul.mubr.bf16.vlgmr.msra.gmra.mrb[0].mxu1 %v75_v14  ;;  %v2521_v14 = vld [vmem:[#allocation5 + $0x1f4] ss:$8 sps:$4 sm:$0xff]  }
  0x69   :  { %1844 = vmatmul.mubr.bf16.vlgmr.msra.gmra.mrb[0].mxu0 %v83_v15  ;;  %1683 = vmatpush1.bf16.msra.mxu1 %v2429_v12  ;;  %v2513_v12 = vld [vmem:[#allocation5 + $0x1e0] ss:$8 sps:$4 sm:$0xff]   ;;  %v2524_v15 = vld [vmem:[#allocation5 + $0x5f4] ss:$8 sps:$4 sm:$0xff]  }
  0x6a   :  { %1855 = vmatpush1.bf16.msra.mxu0 %v2432_v13  ;;  %1684 = vmatprep.subr.bf16.mxu1 %v2437_v16  ;;  %v2516_v13 = vld [vmem:[#allocation5 + $0x5e0] ss:$8 sps:$4 sm:$0xff]   ;;  %v2519_v16 = vld [vmem:[#allocation5 + $0x1f0] ss:$8 sps:$4 sm:$0xff]  }
  0x6b   :  { %1856 = vmatprep.subr.bf16.mxu0 %v2440_v17  ;;  %1714 = vmatprep.mubr.bf16.mxu1 %v78_v44  ;;  %v2522_v17 = vld [vmem:[#allocation5 + $0x5f0] ss:$8 sps:$4 sm:$0xff]  }
  0x6c   :  { %1886 = vmatprep.mubr.bf16.mxu0 %v86_v47  ;;  %v2543_v44 = vld [vmem:[#allocation5 + $0x230] ss:$8 sps:$4 sm:$0xff]   ;;  %v2554_v47 = vld [vmem:[#allocation5 + $0x644] ss:$8 sps:$4 sm:$0xff]  }
  0x6d   :  { %1685 = vmatpush1.bf16.msra.mxu1 %v2435_v18  ;;  %v45_v18 = vld [vmem:[#allocation2 + $0x10] sm:$0xff] }
  0x6e   :  { %1857 = vmatpush1.bf16.msra.mxu0 %v2438_v19  ;;  %1686 = vmatprep.subr.bf16.mxu1 %v2443_v20  ;;  %v2527_v19 = vld [vmem:[#allocation5 + $0x204] ss:$8 sps:$4 sm:$0xff]   ;;  %v61_v20 = vld [vmem:[#allocation2 + $0x90] sm:$0xff] }
  0x6f   :  { %1858 = vmatprep.subr.bf16.mxu0 %v2446_v21  ;;  %v53_v21 = vld [vmem:[#allocation2 + $0x50] sm:$0xff] }
  0x71   :  { %1687 = vmatpush1.bf16.msra.mxu1 %v2441_v22  ;;  %v69_v22 = vld [vmem:[#allocation2 + $0xd0] sm:$0xff] }
  0x72   :  { %1859 = vmatpush1.bf16.msra.mxu0 %v2444_v23  ;;  %1688 = vmatprep.subr.bf16.mxu1 %v2449_v24  ;;  %v2530_v23 = vld [vmem:[#allocation5 + $0x604] ss:$8 sps:$4 sm:$0xff]   ;;  %v2525_v24 = vld [vmem:[#allocation5 + $0x200] ss:$8 sps:$4 sm:$0xff]  }
  0x73   :  { %1860 = vmatprep.subr.bf16.mxu0 %v2452_v25  ;;  %v2528_v25 = vld [vmem:[#allocation5 + $0x600] ss:$8 sps:$4 sm:$0xff]  }
  0x75   :  { %1689 = vmatpush1.bf16.msra.mxu1 %v2447_v26  ;;  %v77_v26 = vpack.c.bf16 %v61_v20, %v45_v18  ;;  %v2605_v18 = vld [vmem:[#allocation5 + $0x2d4] ss:$8 sps:$4 sm:$0xff]   ;;  %v2603_v20 = vld [vmem:[#allocation5 + $0x2d0] ss:$8 sps:$4 sm:$0xff]  }
  0x76   :  { %1861 = vmatpush1.bf16.msra.mxu0 %v2450_v27  ;;  %1690 = vmatprep.subr.bf16.mxu1 %v2455_v28  ;;  %v85_v27 = vpack.c.bf16 %v69_v22, %v53_v21  ;;  %v2533_v28 = vld [vmem:[#allocation5 + $0x214] ss:$8 sps:$4 sm:$0xff]   ;;  %v2606_v21 = vld [vmem:[#allocation5 + $0x6d0] ss:$8 sps:$4 sm:$0xff]   ;;  %v2611_v22 = vld [vmem:[#allocation5 + $0x2e4] ss:$8 sps:$4 sm:$0xff]  }
  0x77   :  { %1862 = vmatprep.subr.bf16.mxu0 %v2458_v29  ;;  %v2536_v29 = vld [vmem:[#allocation5 + $0x614] ss:$8 sps:$4 sm:$0xff]  }
  0x79   :  { %1691 = vmatpush1.bf16.msra.mxu1 %v2453_v30  ;;  %v2531_v30 = vld [vmem:[#allocation5 + $0x210] ss:$8 sps:$4 sm:$0xff]  }
  0x7a   :  { %1863 = vmatpush1.bf16.msra.mxu0 %v2456_v31  ;;  %1692 = vmatprep.subr.bf16.mxu1 %v2461_v32  ;;  %v2534_v31 = vld [vmem:[#allocation5 + $0x610] ss:$8 sps:$4 sm:$0xff]   ;;  %v2539_v32 = vld [vmem:[#allocation5 + $0x224] ss:$8 sps:$4 sm:$0xff]  }
  0x7b   :  { %1864 = vmatprep.subr.bf16.mxu0 %v2464_v33  ;;  %v2542_v33 = vld [vmem:[#allocation5 + $0x624] ss:$8 sps:$4 sm:$0xff]  }
  0x7d   :  { %1693 = vmatpush1.bf16.msra.mxu1 %v2459_v34  ;;  %v48_v34 = vld [vmem:[#allocation2 + $0x28] sm:$0xff] }
  0x7e   :  { %1865 = vmatpush1.bf16.msra.mxu0 %v2462_v35  ;;  %1694 = vmatprep.subr.bf16.mxu1 %v2467_v36  ;;  %v64_v35 = vld [vmem:[#allocation2 + $0xa8] sm:$0xff] }
  0x7f   :  { %1866 = vmatprep.subr.bf16.mxu0 %v2470_v37  ;;  %v80_v36 = vpack.c.bf16 %v64_v35, %v48_v34  ;;  %v2537_v37 = vld [vmem:[#allocation5 + $0x220] ss:$8 sps:$4 sm:$0xff]   ;;  %v2623_v34 = vld [vmem:[#allocation5 + $0x304] ss:$8 sps:$4 sm:$0xff]  }
  0x80   :  { %v2626_v35 = vld [vmem:[#allocation5 + $0x704] ss:$8 sps:$4 sm:$0xff]  }
  0x81   :  { %1695 = vmatpush1.bf16.msra.mxu1 %v2465_v38  ;;  %v56_v38 = vld [vmem:[#allocation2 + $0x68] sm:$0xff] }
  0x82   :  { %1867 = vmatpush1.bf16.msra.mxu0 %v2468_v39  ;;  %1696 = vmatprep.subr.bf16.mxu1 %v2473_v42  ;;  %v72_v39 = vld [vmem:[#allocation2 + $0xe8] sm:$0xff]  ;;  %v2545_v42 = vld [vmem:[#allocation5 + $0x234] ss:$8 sps:$4 sm:$0xff]  }
  0x83   :  { %1868 = vmatprep.subr.bf16.mxu0 %v2476_v43  ;;  %v88_v41 = vpack.c.bf16 %v72_v39, %v56_v38  ;;  %v2548_v43 = vld [vmem:[#allocation5 + $0x634] ss:$8 sps:$4 sm:$0xff]  }
  0x84   :  { %v66_v39 = vld [vmem:[#allocation2 + $0xb8] sm:$0xff] }
  0x85   :  { %1697 = vmatpush1.bf16.msra.mxu1 %v2471_v48  ;;  %v2549_v48 = vld [vmem:[#allocation5 + $0x240] ss:$8 sps:$4 sm:$0xff]  }
  0x86   :  { %1869 = vmatpush1.bf16.msra.mxu0 %v2474_v49  ;;  %1698 = vmatprep.subr.bf16.mxu1 %v2479_v50  ;;  %v2552_v49 = vld [vmem:[#allocation5 + $0x640] ss:$8 sps:$4 sm:$0xff]   ;;  %v2557_v50 = vld [vmem:[#allocation5 + $0x254] ss:$8 sps:$4 sm:$0xff]  }
  0x87   :  { %1870 = vmatprep.subr.bf16.mxu0 %v2482_v51  ;;  %v2560_v51 = vld [vmem:[#allocation5 + $0x654] ss:$8 sps:$4 sm:$0xff]  }
  0x89   :  { %1699 = vmatpush1.bf16.msra.mxu1 %v2477_v52  ;;  %v2555_v52 = vld [vmem:[#allocation5 + $0x250] ss:$8 sps:$4 sm:$0xff]  }
  0x8a   :  { %1871 = vmatpush1.bf16.msra.mxu0 %v2480_v53  ;;  %1700 = vmatprep.subr.bf16.mxu1 %v2485_v54  ;;  %v2558_v53 = vld [vmem:[#allocation5 + $0x650] ss:$8 sps:$4 sm:$0xff]   ;;  %v2563_v54 = vld [vmem:[#allocation5 + $0x264] ss:$8 sps:$4 sm:$0xff]  }
  0x8b   :  { %1872 = vmatprep.subr.bf16.mxu0 %v2488_v55  ;;  %v2566_v55 = vld [vmem:[#allocation5 + $0x664] ss:$8 sps:$4 sm:$0xff]  }
  0x8d   :  { %1701 = vmatpush1.bf16.msra.mxu1 %v2483_v56  ;;  %v2561_v56 = vld [vmem:[#allocation5 + $0x260] ss:$8 sps:$4 sm:$0xff]  }
  0x8e   :  { %1873 = vmatpush1.bf16.msra.mxu0 %v2486_v57  ;;  %1702 = vmatprep.subr.bf16.mxu1 %v2491_v58  ;;  %v2564_v57 = vld [vmem:[#allocation5 + $0x660] ss:$8 sps:$4 sm:$0xff]   ;;  %v2569_v58 = vld [vmem:[#allocation5 + $0x274] ss:$8 sps:$4 sm:$0xff]  }
  0x8f   :  { %1874 = vmatprep.subr.bf16.mxu0 %v2494_v59  ;;  %v2572_v59 = vld [vmem:[#allocation5 + $0x674] ss:$8 sps:$4 sm:$0xff]  }
  0x91   :  { %1703 = vmatpush1.bf16.msra.mxu1 %v2489_v60  ;;  %v2567_v60 = vld [vmem:[#allocation5 + $0x270] ss:$8 sps:$4 sm:$0xff]  }
  0x92   :  { %1875 = vmatpush1.bf16.msra.mxu0 %v2492_v61  ;;  %1704 = vmatprep.subr.bf16.mxu1 %v2497_v62  ;;  %v2570_v61 = vld [vmem:[#allocation5 + $0x670] ss:$8 sps:$4 sm:$0xff]   ;;  %v2575_v62 = vld [vmem:[#allocation5 + $0x284] ss:$8 sps:$4 sm:$0xff]  }
  0x93   :  { %1876 = vmatprep.subr.bf16.mxu0 %v2500_v63  ;;  %v2578_v63 = vld [vmem:[#allocation5 + $0x684] ss:$8 sps:$4 sm:$0xff]  }
  0x95   :  { %1705 = vmatpush1.bf16.msra.mxu1 %v2495_v0  ;;  %v2573_v0 = vld [vmem:[#allocation5 + $0x280] ss:$8 sps:$4 sm:$0xff]  }
  0x96   :  { %1877 = vmatpush1.bf16.msra.mxu0 %v2498_v1  ;;  %1706 = vmatprep.subr.bf16.mxu1 %v2503_v2  ;;  %v2576_v1 = vld [vmem:[#allocation5 + $0x680] ss:$8 sps:$4 sm:$0xff]   ;;  %v2581_v2 = vld [vmem:[#allocation5 + $0x294] ss:$8 sps:$4 sm:$0xff]  }
  0x97   :  { %1878 = vmatprep.subr.bf16.mxu0 %v2506_v3  ;;  %v2584_v3 = vld [vmem:[#allocation5 + $0x694] ss:$8 sps:$4 sm:$0xff]  }
  0x99   :  { %1707 = vmatpush1.bf16.msra.mxu1 %v2501_v4  ;;  %v2579_v4 = vld [vmem:[#allocation5 + $0x290] ss:$8 sps:$4 sm:$0xff]  }
  0x9a   :  { %1879 = vmatpush1.bf16.msra.mxu0 %v2504_v5  ;;  %1708 = vmatprep.subr.bf16.mxu1 %v2509_v6  ;;  %v2582_v5 = vld [vmem:[#allocation5 + $0x690] ss:$8 sps:$4 sm:$0xff]   ;;  %v2587_v6 = vld [vmem:[#allocation5 + $0x2a4] ss:$8 sps:$4 sm:$0xff]  }
  0x9b   :  { %1880 = vmatprep.subr.bf16.mxu0 %v2512_v7  ;;  %v2590_v7 = vld [vmem:[#allocation5 + $0x6a4] ss:$8 sps:$4 sm:$0xff]  }
  0x9d   :  { %1709 = vmatpush1.bf16.msra.mxu1 %v2507_v8  ;;  %v2585_v8 = vld [vmem:[#allocation5 + $0x2a0] ss:$8 sps:$4 sm:$0xff]  }
  0x9e   :  { %1881 = vmatpush1.bf16.msra.mxu0 %v2510_v9  ;;  %1710 = vmatprep.subr.bf16.mxu1 %v2515_v10  ;;  %v2588_v9 = vld [vmem:[#allocation5 + $0x6a0] ss:$8 sps:$4 sm:$0xff]   ;;  %v2593_v10 = vld [vmem:[#allocation5 + $0x2b4] ss:$8 sps:$4 sm:$0xff]  }
  0x9f   :  { %1882 = vmatprep.subr.bf16.mxu0 %v2518_v11  ;;  %v2596_v11 = vld [vmem:[#allocation5 + $0x6b4] ss:$8 sps:$4 sm:$0xff]  }
  0xa1   :  { %1711 = vmatpush1.bf16.msra.mxu1 %v2513_v12  ;;  %v2591_v12 = vld [vmem:[#allocation5 + $0x2b0] ss:$8 sps:$4 sm:$0xff]  }
  0xa2   :  { %1883 = vmatpush1.bf16.msra.mxu0 %v2516_v13  ;;  %1712 = vmatprep.subr.bf16.mxu1 %v2521_v14  ;;  %v2594_v13 = vld [vmem:[#allocation5 + $0x6b0] ss:$8 sps:$4 sm:$0xff]   ;;  %v2599_v14 = vld [vmem:[#allocation5 + $0x2c4] ss:$8 sps:$4 sm:$0xff]  }
  0xa3   :  { %1884 = vmatprep.subr.bf16.mxu0 %v2524_v15  ;;  %v2602_v15 = vld [vmem:[#allocation5 + $0x6c4] ss:$8 sps:$4 sm:$0xff]  }
  0xa5   :  { %1713 = vmatpush1.bf16.msra.mxu1 %v2519_v16  ;;  %v2597_v16 = vld [vmem:[#allocation5 + $0x2c0] ss:$8 sps:$4 sm:$0xff]  }
  0xa6   :  { %1885 = vmatpush1.bf16.msra.mxu0 %v2522_v17  ;;  %1725 = vmatprep.subr.bf16.mxu1 %v2527_v19  ;;  %v2600_v17 = vld [vmem:[#allocation5 + $0x6c0] ss:$8 sps:$4 sm:$0xff]   ;;  %v2608_v19 = vld [vmem:[#allocation5 + $0x6d4] ss:$8 sps:$4 sm:$0xff]  }
  0xa7   :  { %1897 = vmatprep.subr.bf16.mxu0 %v2530_v23  ;;  %v2614_v23 = vld [vmem:[#allocation5 + $0x6e4] ss:$8 sps:$4 sm:$0xff]  }
  0xa8   :  { %1715 = vmatmul.mubr.bf16.vlgmr.msra.gmra.mrb[0].mxu1 %v77_v26  ;;  %v2617_v26 = vld [vmem:[#allocation5 + $0x2f4] ss:$8 sps:$4 sm:$0xff]  }
  0xa9   :  { %1887 = vmatmul.mubr.bf16.vlgmr.msra.gmra.mrb[0].mxu0 %v85_v27  ;;  %1726 = vmatpush1.bf16.msra.mxu1 %v2525_v24  ;;  %v2609_v24 = vld [vmem:[#allocation5 + $0x2e0] ss:$8 sps:$4 sm:$0xff]   ;;  %v2620_v27 = vld [vmem:[#allocation5 + $0x6f4] ss:$8 sps:$4 sm:$0xff]  }
  0xaa   :  { %1898 = vmatpush1.bf16.msra.mxu0 %v2528_v25  ;;  %1727 = vmatprep.subr.bf16.mxu1 %v2533_v28  ;;  %v2612_v25 = vld [vmem:[#allocation5 + $0x6e0] ss:$8 sps:$4 sm:$0xff]   ;;  %v2615_v28 = vld [vmem:[#allocation5 + $0x2f0] ss:$8 sps:$4 sm:$0xff]  }
  0xab   :  { %1899 = vmatprep.subr.bf16.mxu0 %v2536_v29  ;;  %1757 = vmatprep.mubr.bf16.mxu1 %v80_v36  ;;  %v2618_v29 = vld [vmem:[#allocation5 + $0x6f0] ss:$8 sps:$4 sm:$0xff]  }
  0xac   :  { %1929 = vmatprep.mubr.bf16.mxu0 %v88_v41  ;;  %v50_v36 = vld [vmem:[#allocation2 + $0x38] sm:$0xff] }
  0xad   :  { %1728 = vmatpush1.bf16.msra.mxu1 %v2531_v30  ;;  %v47_v30 = vld [vmem:[#allocation2 + $0x20] sm:$0xff]  ;;  %v74_v41 = vld [vmem:[#allocation2 + $0xf8] sm:$0xff] }
  0xae   :  { %1900 = vmatpush1.bf16.msra.mxu0 %v2534_v31  ;;  %1729 = vmatprep.subr.bf16.mxu1 %v2539_v32  ;;  %v63_v31 = vld [vmem:[#allocation2 + $0xa0] sm:$0xff] }
  0xaf   :  { %1901 = vmatprep.subr.bf16.mxu0 %v2542_v33  ;;  %v55_v32 = vld [vmem:[#allocation2 + $0x60] sm:$0xff] }
  0xb0   :  { %v71_v33 = vld [vmem:[#allocation2 + $0xe0] sm:$0xff] }
  0xb1   :  { %1730 = vmatpush1.bf16.msra.mxu1 %v2537_v37  ;;  %v79_v37 = vpack.c.bf16 %v63_v31, %v47_v30  ;;  %v87_v38 = vpack.c.bf16 %v71_v33, %v55_v32  ;;  %v2701_v30 = vld [vmem:[#allocation5 + $0x3d4] ss:$8 sps:$4 sm:$0xff]   ;;  %v2699_v32 = vld [vmem:[#allocation5 + $0x3d0] ss:$8 sps:$4 sm:$0xff]  }
  0xb2   :  { %1902 = vmatpush1.bf16.msra.mxu0 %v2540_v40  ;;  %1731 = vmatprep.subr.bf16.mxu1 %v2545_v42  ;;  %v58_v40 = vld [vmem:[#allocation2 + $0x78] sm:$0xff]  ;;  %v2621_v42 = vld [vmem:[#allocation5 + $0x300] ss:$8 sps:$4 sm:$0xff]  }
  0xb3   :  { %1903 = vmatprep.subr.bf16.mxu0 %v2548_v43  ;;  %v2624_v43 = vld [vmem:[#allocation5 + $0x700] ss:$8 sps:$4 sm:$0xff]   ;;  %v2704_v31 = vld [vmem:[#allocation5 + $0x7d4] ss:$8 sps:$4 sm:$0xff]   ;;  %v2702_v33 = vld [vmem:[#allocation5 + $0x7d0] ss:$8 sps:$4 sm:$0xff]  }
  0xb5   :  { %1732 = vmatpush1.bf16.msra.mxu1 %v2543_v44  ;;  %v2629_v44 = vld [vmem:[#allocation5 + $0x314] ss:$8 sps:$4 sm:$0xff]  }
  0xb6   :  { %1904 = vmatpush1.bf16.msra.mxu0 %v2546_v45  ;;  %1733 = vmatprep.subr.bf16.mxu1 %v2551_v46  ;;  %v2632_v45 = vld [vmem:[#allocation5 + $0x714] ss:$8 sps:$4 sm:$0xff]   ;;  %v82_v46 = vpack.c.bf16 %v66_v39, %v50_v36  ;;  %v2705_v36 = vld [vmem:[#allocation5 + $0x3e0] ss:$8 sps:$4 sm:$0xff]  }
  0xb7   :  { %1905 = vmatprep.subr.bf16.mxu0 %v2554_v47  ;;  %v90_v47 = vpack.c.bf16 %v74_v41, %v58_v40  ;;  %v2716_v39 = vld [vmem:[#allocation5 + $0x7f4] ss:$8 sps:$4 sm:$0xff]   ;;  %v2711_v40 = vld [vmem:[#allocation5 + $0x3f0] ss:$8 sps:$4 sm:$0xff]  }
  0xb8   :  { %v2714_v41 = vld [vmem:[#allocation5 + $0x7f0] ss:$8 sps:$4 sm:$0xff]  }
  0xb9   :  { %1734 = vmatpush1.bf16.msra.mxu1 %v2549_v48  ;;  %v2627_v48 = vld [vmem:[#allocation5 + $0x310] ss:$8 sps:$4 sm:$0xff]  }
  0xba   :  { %1906 = vmatpush1.bf16.msra.mxu0 %v2552_v49  ;;  %1735 = vmatprep.subr.bf16.mxu1 %v2557_v50  ;;  %v2630_v49 = vld [vmem:[#allocation5 + $0x710] ss:$8 sps:$4 sm:$0xff]   ;;  %v2635_v50 = vld [vmem:[#allocation5 + $0x324] ss:$8 sps:$4 sm:$0xff]  }
  0xbb   :  { %1907 = vmatprep.subr.bf16.mxu0 %v2560_v51  ;;  %v2638_v51 = vld [vmem:[#allocation5 + $0x724] ss:$8 sps:$4 sm:$0xff]  }
  0xbd   :  { %1736 = vmatpush1.bf16.msra.mxu1 %v2555_v52  ;;  %v2633_v52 = vld [vmem:[#allocation5 + $0x320] ss:$8 sps:$4 sm:$0xff]  }
  0xbe   :  { %1908 = vmatpush1.bf16.msra.mxu0 %v2558_v53  ;;  %1737 = vmatprep.subr.bf16.mxu1 %v2563_v54  ;;  %v2636_v53 = vld [vmem:[#allocation5 + $0x720] ss:$8 sps:$4 sm:$0xff]   ;;  %v2641_v54 = vld [vmem:[#allocation5 + $0x334] ss:$8 sps:$4 sm:$0xff]  }
  0xbf   :  { %1909 = vmatprep.subr.bf16.mxu0 %v2566_v55  ;;  %v2644_v55 = vld [vmem:[#allocation5 + $0x734] ss:$8 sps:$4 sm:$0xff]  }
  0xc1   :  { %1738 = vmatpush1.bf16.msra.mxu1 %v2561_v56  ;;  %v2639_v56 = vld [vmem:[#allocation5 + $0x330] ss:$8 sps:$4 sm:$0xff]  }
  0xc2   :  { %1910 = vmatpush1.bf16.msra.mxu0 %v2564_v57  ;;  %1739 = vmatprep.subr.bf16.mxu1 %v2569_v58  ;;  %v2642_v57 = vld [vmem:[#allocation5 + $0x730] ss:$8 sps:$4 sm:$0xff]   ;;  %v2647_v58 = vld [vmem:[#allocation5 + $0x344] ss:$8 sps:$4 sm:$0xff]  }
  0xc3   :  { %1911 = vmatprep.subr.bf16.mxu0 %v2572_v59  ;;  %v2650_v59 = vld [vmem:[#allocation5 + $0x744] ss:$8 sps:$4 sm:$0xff]  }
  0xc5   :  { %1740 = vmatpush1.bf16.msra.mxu1 %v2567_v60  ;;  %v2645_v60 = vld [vmem:[#allocation5 + $0x340] ss:$8 sps:$4 sm:$0xff]  }
  0xc6   :  { %1912 = vmatpush1.bf16.msra.mxu0 %v2570_v61  ;;  %1741 = vmatprep.subr.bf16.mxu1 %v2575_v62  ;;  %v2648_v61 = vld [vmem:[#allocation5 + $0x740] ss:$8 sps:$4 sm:$0xff]   ;;  %v2653_v62 = vld [vmem:[#allocation5 + $0x354] ss:$8 sps:$4 sm:$0xff]  }
  0xc7   :  { %1913 = vmatprep.subr.bf16.mxu0 %v2578_v63  ;;  %v2656_v63 = vld [vmem:[#allocation5 + $0x754] ss:$8 sps:$4 sm:$0xff]  }
  0xc9   :  { %1742 = vmatpush1.bf16.msra.mxu1 %v2573_v0  ;;  %v2651_v0 = vld [vmem:[#allocation5 + $0x350] ss:$8 sps:$4 sm:$0xff]  }
  0xca   :  { %1914 = vmatpush1.bf16.msra.mxu0 %v2576_v1  ;;  %1743 = vmatprep.subr.bf16.mxu1 %v2581_v2  ;;  %v2654_v1 = vld [vmem:[#allocation5 + $0x750] ss:$8 sps:$4 sm:$0xff]   ;;  %v2659_v2 = vld [vmem:[#allocation5 + $0x364] ss:$8 sps:$4 sm:$0xff]  }
  0xcb   :  { %1915 = vmatprep.subr.bf16.mxu0 %v2584_v3  ;;  %v2662_v3 = vld [vmem:[#allocation5 + $0x764] ss:$8 sps:$4 sm:$0xff]  }
  0xcd   :  { %1744 = vmatpush1.bf16.msra.mxu1 %v2579_v4  ;;  %v2657_v4 = vld [vmem:[#allocation5 + $0x360] ss:$8 sps:$4 sm:$0xff]  }
  0xce   :  { %1916 = vmatpush1.bf16.msra.mxu0 %v2582_v5  ;;  %1745 = vmatprep.subr.bf16.mxu1 %v2587_v6  ;;  %v2660_v5 = vld [vmem:[#allocation5 + $0x760] ss:$8 sps:$4 sm:$0xff]   ;;  %v2665_v6 = vld [vmem:[#allocation5 + $0x374] ss:$8 sps:$4 sm:$0xff]  }
  0xcf   :  { %1917 = vmatprep.subr.bf16.mxu0 %v2590_v7  ;;  %v2668_v7 = vld [vmem:[#allocation5 + $0x774] ss:$8 sps:$4 sm:$0xff]  }
  0xd1   :  { %1746 = vmatpush1.bf16.msra.mxu1 %v2585_v8  ;;  %v2663_v8 = vld [vmem:[#allocation5 + $0x370] ss:$8 sps:$4 sm:$0xff]  }
  0xd2   :  { %1918 = vmatpush1.bf16.msra.mxu0 %v2588_v9  ;;  %1747 = vmatprep.subr.bf16.mxu1 %v2593_v10  ;;  %v2666_v9 = vld [vmem:[#allocation5 + $0x770] ss:$8 sps:$4 sm:$0xff]   ;;  %v2671_v10 = vld [vmem:[#allocation5 + $0x384] ss:$8 sps:$4 sm:$0xff]  }
  0xd3   :  { %1919 = vmatprep.subr.bf16.mxu0 %v2596_v11  ;;  %v2674_v11 = vld [vmem:[#allocation5 + $0x784] ss:$8 sps:$4 sm:$0xff]  }
  0xd5   :  { %1748 = vmatpush1.bf16.msra.mxu1 %v2591_v12  ;;  %v2669_v12 = vld [vmem:[#allocation5 + $0x380] ss:$8 sps:$4 sm:$0xff]  }
  0xd6   :  { %1920 = vmatpush1.bf16.msra.mxu0 %v2594_v13  ;;  %1749 = vmatprep.subr.bf16.mxu1 %v2599_v14  ;;  %v2672_v13 = vld [vmem:[#allocation5 + $0x780] ss:$8 sps:$4 sm:$0xff]   ;;  %v2677_v14 = vld [vmem:[#allocation5 + $0x394] ss:$8 sps:$4 sm:$0xff]  }
  0xd7   :  { %1921 = vmatprep.subr.bf16.mxu0 %v2602_v15  ;;  %v2680_v15 = vld [vmem:[#allocation5 + $0x794] ss:$8 sps:$4 sm:$0xff]  }
  0xd9   :  { %1750 = vmatpush1.bf16.msra.mxu1 %v2597_v16  ;;  %v2675_v16 = vld [vmem:[#allocation5 + $0x390] ss:$8 sps:$4 sm:$0xff]  }
  0xda   :  { %1922 = vmatpush1.bf16.msra.mxu0 %v2600_v17  ;;  %1751 = vmatprep.subr.bf16.mxu1 %v2605_v18  ;;  %v2678_v17 = vld [vmem:[#allocation5 + $0x790] ss:$8 sps:$4 sm:$0xff]   ;;  %v2683_v18 = vld [vmem:[#allocation5 + $0x3a4] ss:$8 sps:$4 sm:$0xff]  }
  0xdb   :  { %1923 = vmatprep.subr.bf16.mxu0 %v2608_v19  ;;  %v2686_v19 = vld [vmem:[#allocation5 + $0x7a4] ss:$8 sps:$4 sm:$0xff]  }
  0xdd   :  { %1752 = vmatpush1.bf16.msra.mxu1 %v2603_v20  ;;  %v2681_v20 = vld [vmem:[#allocation5 + $0x3a0] ss:$8 sps:$4 sm:$0xff]  }
  0xde   :  { %1924 = vmatpush1.bf16.msra.mxu0 %v2606_v21  ;;  %1753 = vmatprep.subr.bf16.mxu1 %v2611_v22  ;;  %v2684_v21 = vld [vmem:[#allocation5 + $0x7a0] ss:$8 sps:$4 sm:$0xff]   ;;  %v2689_v22 = vld [vmem:[#allocation5 + $0x3b4] ss:$8 sps:$4 sm:$0xff]  }
  0xdf   :  { %1925 = vmatprep.subr.bf16.mxu0 %v2614_v23  ;;  %v2692_v23 = vld [vmem:[#allocation5 + $0x7b4] ss:$8 sps:$4 sm:$0xff]  }
  0xe1   :  { %1754 = vmatpush1.bf16.msra.mxu1 %v2609_v24  ;;  %v2687_v24 = vld [vmem:[#allocation5 + $0x3b0] ss:$8 sps:$4 sm:$0xff]  }
  0xe2   :  { %1926 = vmatpush1.bf16.msra.mxu0 %v2612_v25  ;;  %1755 = vmatprep.subr.bf16.mxu1 %v2617_v26  ;;  %v2690_v25 = vld [vmem:[#allocation5 + $0x7b0] ss:$8 sps:$4 sm:$0xff]   ;;  %v2695_v26 = vld [vmem:[#allocation5 + $0x3c4] ss:$8 sps:$4 sm:$0xff]  }
  0xe3   :  { %1927 = vmatprep.subr.bf16.mxu0 %v2620_v27  ;;  %v2698_v27 = vld [vmem:[#allocation5 + $0x7c4] ss:$8 sps:$4 sm:$0xff]  }
  0xe5   :  { %1756 = vmatpush1.bf16.msra.mxu1 %v2615_v28  ;;  %v2693_v28 = vld [vmem:[#allocation5 + $0x3c0] ss:$8 sps:$4 sm:$0xff]  }
  0xe6   :  { %1928 = vmatpush1.bf16.msra.mxu0 %v2618_v29  ;;  %1768 = vmatprep.subr.bf16.mxu1 %v2623_v34  ;;  %v2696_v29 = vld [vmem:[#allocation5 + $0x7c0] ss:$8 sps:$4 sm:$0xff]   ;;  %v2707_v34 = vld [vmem:[#allocation5 + $0x3e4] ss:$8 sps:$4 sm:$0xff]  }
  0xe7   :  { %1940 = vmatprep.subr.bf16.mxu0 %v2626_v35  ;;  %v2710_v35 = vld [vmem:[#allocation5 + $0x7e4] ss:$8 sps:$4 sm:$0xff]  }
  0xe8   :  { %1758 = vmatmul.mubr.bf16.vlgmr.msra.gmra.mrb[0].mxu1 %v79_v37  ;;  %v2708_v37 = vld [vmem:[#allocation5 + $0x7e0] ss:$8 sps:$4 sm:$0xff]  }
  0xe9   :  { %1930 = vmatmul.mubr.bf16.vlgmr.msra.gmra.mrb[0].mxu0 %v87_v38  ;;  %1769 = vmatpush1.bf16.msra.mxu1 %v2621_v42  ;;  %v2713_v38 = vld [vmem:[#allocation5 + $0x3f4] ss:$8 sps:$4 sm:$0xff]  }
  0xea   :  { %1941 = vmatpush1.bf16.msra.mxu0 %v2624_v43  ;;  %1770 = vmatprep.subr.bf16.mxu1 %v2629_v44  ;;  %v49_v42 = vld [vmem:[#allocation2 + $0x30] sm:$0xff] }
  0xeb   :  { %1942 = vmatprep.subr.bf16.mxu0 %v2632_v45  ;;  %1800 = vmatprep.mubr.bf16.mxu1 %v82_v46  ;;  %v65_v43 = vld [vmem:[#allocation2 + $0xb0] sm:$0xff] }
  0xec   :  { %1972 = vmatprep.mubr.bf16.mxu0 %v90_v47  ;;  %v57_v44 = vld [vmem:[#allocation2 + $0x70] sm:$0xff]  ;;  %v81_v46 = vpack.c.bf16 %v65_v43, %v49_v42 }
  0xed   :  { %1771 = vmatpush1.bf16.msra.mxu1 %v2627_v48  ;;  %v73_v45 = vld [vmem:[#allocation2 + $0xf0] sm:$0xff]  ;;  %v349_v48 = vlaneseq }
  0xee   :  { %1943 = vmatpush1.bf16.msra.mxu0 %v2630_v49  ;;  %1772 = vmatprep.subr.bf16.mxu1 %v2635_v50  ;;  %v89_v47 = vpack.c.bf16 %v73_v45, %v57_v44 }
  0xef   :  { %1944 = vmatprep.subr.bf16.mxu0 %v2638_v51  ;;  %v350_v49 = vshrl.u32 %v349_v48, 7  ;;  %v347_v51 = vld [vmem:[%s2866_s2] sm:$0x3]  ;;  %s2802_s2 = smov [#allocation7]  }
  0xf0   :  { %s2024_s12 = sshll.u32 %s2802_s2, 4  ;;  %s2025_s12 = int_to_ptr.vmem [resolvable:$true] %s2024_s12 }
  0xf1   :  { %1773 = vmatpush1.bf16.msra.mxu1 %v2633_v52  ;;  %v351_v50 = vsub.s32 0, %v350_v49  ;;  %v355_v52 = vsub.s32 1, %v350_v49  ;;  %s2769_s13 = scalar_lea.vmem %s2025_s12, 512  ;;  %p2774_p3 = scmp.lt.s32.totalorder %s2025_s12, %s2025_s12 }
  0xf2   :  { %1945 = vmatpush1.bf16.msra.mxu0 %v2636_v53  ;;  %1774 = vmatprep.subr.bf16.mxu1 %v2641_v54  ;;  %p2770_p2 = scmp.ne.s32.totalorder %s2025_s12, %s2769_s13  ;;  %p2775_p4 = scmp.lt.s32.totalorder %s2769_s13, %s2769_s13 }
  0xf3   :  { %1946 = vmatprep.subr.bf16.mxu0 %v2644_v55  ;;  %v352_v53 = vrot.slane %v347_v51, %v351_v50  ;;  %v356_v54 = vrot.slane %v347_v51, %v355_v52 }
  0xf4   :  { %p2776_p5 = por %p2775_p4, %p2774_p3 }
  0xf5   :  { %1775 = vmatpush1.bf16.msra.mxu1 %v2639_v56 }
  0xf6   :  { %1947 = vmatpush1.bf16.msra.mxu0 %v2642_v57  ;;  %1776 = vmatprep.subr.bf16.mxu1 %v2647_v58  ;;  %p2777_p6 = pnand %p2776_p5, %p2770_p2 }
  0xf7   :  { %1948 = vmatprep.subr.bf16.mxu0 %v2650_v59 }
  0xf9   :  { %1777 = vmatpush1.bf16.msra.mxu1 %v2645_v60 }
  0xfa   :  { %1949 = vmatpush1.bf16.msra.mxu0 %v2648_v61  ;;  %1778 = vmatprep.subr.bf16.mxu1 %v2653_v62 }
  0xfb   :  { %1950 = vmatprep.subr.bf16.mxu0 %v2656_v63 }
  0xfd   :  { %1779 = vmatpush1.bf16.msra.mxu1 %v2651_v0 }
  0xfe   :  { %1951 = vmatpush1.bf16.msra.mxu0 %v2654_v1  ;;  %1780 = vmatprep.subr.bf16.mxu1 %v2659_v2 }
  0xff   :  { %1952 = vmatprep.subr.bf16.mxu0 %v2662_v3 }
 0x101   :  { %1781 = vmatpush1.bf16.msra.mxu1 %v2657_v4 }
 0x102   :  { %1953 = vmatpush1.bf16.msra.mxu0 %v2660_v5  ;;  %1782 = vmatprep.subr.bf16.mxu1 %v2665_v6 }
 0x103   :  { %1954 = vmatprep.subr.bf16.mxu0 %v2668_v7 }
 0x105   :  { %1783 = vmatpush1.bf16.msra.mxu1 %v2663_v8 }
 0x106   :  { %1955 = vmatpush1.bf16.msra.mxu0 %v2666_v9  ;;  %1784 = vmatprep.subr.bf16.mxu1 %v2671_v10 }
 0x107   :  { %1956 = vmatprep.subr.bf16.mxu0 %v2674_v11 }
 0x109   :  { %1785 = vmatpush1.bf16.msra.mxu1 %v2669_v12 }
 0x10a   :  { %1957 = vmatpush1.bf16.msra.mxu0 %v2672_v13  ;;  %1786 = vmatprep.subr.bf16.mxu1 %v2677_v14 }
 0x10b   :  { %1958 = vmatprep.subr.bf16.mxu0 %v2680_v15 }
 0x10d   :  { %1787 = vmatpush1.bf16.msra.mxu1 %v2675_v16 }
 0x10e   :  { %1959 = vmatpush1.bf16.msra.mxu0 %v2678_v17  ;;  %1788 = vmatprep.subr.bf16.mxu1 %v2683_v18 }
 0x10f   :  { %1960 = vmatprep.subr.bf16.mxu0 %v2686_v19 }
 0x111   :  { %1789 = vmatpush1.bf16.msra.mxu1 %v2681_v20 }
 0x112   :  { %1961 = vmatpush1.bf16.msra.mxu0 %v2684_v21  ;;  %1790 = vmatprep.subr.bf16.mxu1 %v2689_v22 }
 0x113   :  { %1962 = vmatprep.subr.bf16.mxu0 %v2692_v23 }
 0x115   :  { %1791 = vmatpush1.bf16.msra.mxu1 %v2687_v24 }
 0x116   :  { %1963 = vmatpush1.bf16.msra.mxu0 %v2690_v25  ;;  %1792 = vmatprep.subr.bf16.mxu1 %v2695_v26 }
 0x117   :  { %1964 = vmatprep.subr.bf16.mxu0 %v2698_v27 }
 0x119   :  { %1793 = vmatpush1.bf16.msra.mxu1 %v2693_v28 }
 0x11a   :  { %1965 = vmatpush1.bf16.msra.mxu0 %v2696_v29  ;;  %1794 = vmatprep.subr.bf16.mxu1 %v2701_v30 }
 0x11b   :  { %1966 = vmatprep.subr.bf16.mxu0 %v2704_v31 }
 0x11d   :  { %1795 = vmatpush1.bf16.msra.mxu1 %v2699_v32 }
 0x11e   :  { %1967 = vmatpush1.bf16.msra.mxu0 %v2702_v33  ;;  %1796 = vmatprep.subr.bf16.mxu1 %v2707_v34 }
 0x11f   :  { %1968 = vmatprep.subr.bf16.mxu0 %v2710_v35 }
 0x121   :  { %1797 = vmatpush1.bf16.msra.mxu1 %v2705_v36 }
 0x122   :  { %1969 = vmatpush1.bf16.msra.mxu0 %v2708_v37  ;;  %1798 = vmatprep.subr.bf16.mxu1 %v2713_v38 }
 0x123   :  { %1970 = vmatprep.subr.bf16.mxu0 %v2716_v39 }
 0x125   :  { %1799 = vmatpush1.bf16.msra.mxu1 %v2711_v40 }
 0x126   :  { %1971 = vmatpush1.bf16.msra.mxu0 %v2714_v41 }
 0x128   :  { %1801 = vmatmul.mubr.bf16.vlgmr.msra.gmra.mrb[0].mxu1 %v81_v46 }
 0x129   :  { %1973 = vmatmul.mubr.bf16.vlgmr.msra.gmra.mrb[0].mxu0 %v89_v47 }
 0x1fb   :  { %v1802_v55 = vpop.f32.mrb[0].mxu1 }
 0x1fc   :  { %v1974_v56 = vpop.f32.mrb[0].mxu0  ;;  %v2293_v57 = vadd.f32 %v1802_v55, %v352_v53  ;;  %v1804_v58 = vpop.f32.mrb[1].mxu1 }
 0x1fd   :  { %v1976_v59 = vpop.f32.mrb[1].mxu0  ;;  %v2295_v60 = vadd.f32 %v1804_v58, %v356_v54  ;;  %v1806_v61 = vpop.f32.mrb[2].mxu1 }
 0x1fe   :  { %v1978_v62 = vpop.f32.mrb[2].mxu0  ;;  %v2294_v63 = vadd.f32 %v2293_v57, %v1974_v56  ;;  %v2297_v0 = vadd.f32 %v1806_v61, %v352_v53  ;;  %v1808_v1 = vpop.f32.mrb[3].mxu1 }
 0x1ff   :  { %v1980_v2 = vpop.f32.mrb[3].mxu0  ;;  %v2296_v3 = vadd.f32 %v2295_v60, %v1976_v59  ;;  %v2299_v4 = vadd.f32 %v1808_v1, %v356_v54 }
 0x200   :  { %v2298_v5 = vadd.f32 %v2297_v0, %v1978_v62  ;;  %v1983_v6 = vmul.f32 %v2294_v63, %v2294_v63 }
 0x201   :  { %v2300_v7 = vadd.f32 %v2299_v4, %v1980_v2  ;;  %v1984_v8 = vmul.f32 %v2296_v3, %v2296_v3 }
 0x202   :  { %v1985_v9 = vmul.f32 %v2298_v5, %v2298_v5 }
 0x203   :  { %v1986_v10 = vmul.f32 %v2300_v7, %v2300_v7  ;;  %v1987_v11 = vadd.f32 %v1984_v8, %v1983_v6 }
 0x205   :  { %1988 = vadd.xlane.f32.xlu0 %v1987_v11  ;;  %v1990_v12 = vadd.f32 %v1986_v10, %v1985_v9 }
 0x209   :  { %1991 = vadd.xlane.f32.xlu0 %v1990_v12 }
 0x292   :  { %v1989_v13 = vpop.xlane.xlu0 %1988 }
 0x293   :  { %2717 = vrsqrt.f32 %v1989_v13  ;;  %vm1995_vm0 = vcmp.eq.f32.partialorder %v1989_v13, inf  ;;  %v1998_v17 = vand.u32 2147483648, %v1989_v13  ;;  %vm1997_vm1 = vcmp.eq.f32.partialorder %v1989_v13, 0.0 }
 0x296   :  { %v1992_v14 = vpop.xlane.xlu0 %1991 }
 0x297   :  { %2719 = vrsqrt.f32 %v1992_v14  ;;  %vm2002_vm2 = vcmp.eq.f32.partialorder %v1992_v14, inf  ;;  %v2005_v23 = vand.u32 2147483648, %v1992_v14  ;;  %vm2004_vm3 = vcmp.eq.f32.partialorder %v1992_v14, 0.0 }
 0x29d   :  { %v2718_v15 = vpop.eup %2717 }
 0x29e   :  { %v1994_v16 = vmul.f32 %v2718_v15, %v1989_v13 }
 0x2a0   :  { %v1996_v18 = vsel %vm1995_vm0, %v1989_v13, %v1994_v16 }
 0x2a1   :  { %v2720_v19 = vpop.eup %2719  ;;  %v1999_v20 = vsel %vm1997_vm1, %v1998_v17, %v1996_v18 }
 0x2a2   :  { %v2007_v21 = vadd.f32 1e-08, %v1999_v20  ;;  %v2001_v22 = vmul.f32 %v2720_v19, %v1992_v14 }
 0x2a4   :  { %2721 = vrcp.f32 %v2007_v21  ;;  %v2003_v24 = vsel %vm2002_vm2, %v1992_v14, %v2001_v22 }
 0x2a5   :  { %v2006_v25 = vsel %vm2004_vm3, %v2005_v23, %v2003_v24 }
 0x2a6   :  { %v2008_v26 = vadd.f32 1e-08, %v2006_v25 }
 0x2a8   :  { %2723 = vrcp.f32 %v2008_v26 }
 0x2ae   :  { %v2722_v27 = vpop.eup %2721 }
 0x2af   :  { %v2011_v28 = vmul.f32 %v2722_v27, %v2294_v63  ;;  %v2012_v29 = vmul.f32 %v2722_v27, %v2296_v3 }
 0x2b1   :  { %2015 = vst [vmem:[#allocation7] sm:$0xff] %v2011_v28  ;;  %2016 = vst [vmem:[#allocation7 + $0x8] sm:$0xff] %v2012_v29 }
 0x2b2   :  { %v2724_v30 = vpop.eup %2723 }
 0x2b3   :  { %v2013_v31 = vmul.f32 %v2724_v30, %v2298_v5  ;;  %v2014_v32 = vmul.f32 %v2724_v30, %v2300_v7 }
 0x2b5   :  { %2017 = vst [vmem:[#allocation7 + $0x10] sm:$0xff] %v2013_v31  ;;  %2018 = vst [vmem:[#allocation7 + $0x18] sm:$0xff] %v2014_v32 }
 0x2b6   :  { %2780 = shalt.err (!%p2777_p6)
}
 0x2b7   :  { %s2781_s16 = scalar_lea.hbm %s2867_s3, 512 }
 0x2b8   :  { %p2782_p7 = scmp.ne.s32.totalorder %s2867_s3, %s2781_s16  ;;  %p2785_p8 = scmp.lt.u32.totalorder %s2781_s16, %s2867_s3 }
 0x2ba   :  { %p2787_p9 = pnand %p2785_p8, %p2782_p7 }
 0x2bc   :  { %2790 = shalt.err (!%p2787_p9)
}
 0x2bd   :  { %s2803_s21 = smov 256   ;;  %s2804_s22 = smov 16  }
 0x2be   :  { %2030 = dma.vmem_to_hbm [thread:$0]  %s2025_s12, 512, %s2867_s3, [#allocation4], %s2803_s21, %s2803_s21, %s2804_s22  }
 0x2bf   :  { %2795 = dma.done.wait [#allocation4], 512  }
 0x2c0   :  { %2796 = vsyncadd [#allocation4], 4294966784 }
 0x2c1   :  { %2034 = vsyncpa [#allocation3], 1 }
 0x2c2   :  { %2035 = vsyncpa [#allocation6], 1 }
 0x2c3   :  { %2036 = vsyncpa [#allocation4], 1 }

</bundles_post_ra>
